<compile_context>
chip_gen: v7x
topology: tpu7x:2x2x1
jax: 0.10.0
libtpu: 0.0.40
codegen_flags: <defaults>
</compile_context>

<pallas_src>
import functools

import jax
import jax.numpy as jnp
from jax import lax
from jax.experimental import pallas as pl
from jax.experimental.pallas import tpu as pltpu


# ------------------------------------------------------------------------------------------------
# Fused kernel: one image per grid step. conv-as-single-matmul + ReLU + mean-pool + folded head.
# No scratch; every intermediate stays in vregs.
# ------------------------------------------------------------------------------------------------
def _fused_kernel(x_ref, w36_ref, bconv_ref, whead_ref, bhead_ref, o_ref, *, inv_hw):
    """
    x_ref     : (S, 9*Cin)    im2col patches of image b (row = h*W + w, valid positions only)
    w36_ref   : (9*Cin, Cout) conv weight, column order (kh, kw, cin)
    bconv_ref : (1, Cout)
    whead_ref : (Cout, 128)   fc_feat @ proj @ classifier folded, zero-padded lane-dense
    bhead_ref : (1, 128)
    o_ref     : (1, 8, 128)   logits row broadcast over 8 sublanes -> full-width unmasked store
    """
    # conv3x3(pad=1) for the whole image as one MXU matmul, f32 accumulation.
    conv = jnp.dot(x_ref[...], w36_ref[...], preferred_element_type=jnp.float32)   # (S, Cout)
    conv = jnp.maximum(conv + bconv_ref[...], 0.0)                                  # bias+ReLU (VPU)

    # Global average pool: sublane/XLU reduce over the S valid positions (no mask needed).
    pooled = jnp.sum(conv, axis=0, keepdims=True) * inv_hw                          # (1, Cout)

    # Folded head: logits = pooled @ (fc_feat @ proj @ cls) + folded bias.
    logits = jnp.dot(pooled, whead_ref[...], preferred_element_type=jnp.float32) + bhead_ref[...]
    o_ref[...] = jnp.broadcast_to(logits, o_ref.shape).astype(o_ref.dtype)          # (1, 8, 128)


# ------------------------------------------------------------------------------------------------
# Parameter folding: done ONCE per model, outside the per-call path.
# ------------------------------------------------------------------------------------------------
def fold_params(params, n_cls_pad=128):
    w_conv = params["conv_w"]                                  # (Cout, Cin, 3, 3) OIHW
    Cout, Cin = w_conv.shape[0], w_conv.shape[1]
    num_classes = params["cls_b"].shape[0]

    # Conv weight as a single (9*Cin, Cout) matrix; column order (kh, kw, cin) matches im2col.
    w36 = jnp.transpose(w_conv, (2, 3, 1, 0)).reshape(9 * Cin, Cout).astype(jnp.float32)
    b_conv = params["conv_b"].reshape(1, Cout).astype(jnp.float32)

    # fc_feat -> proj -> classifier (no nonlinearity between them) folded into one affine, in f32.
    w_head = params["fc_feat_w"] @ params["proj_w"] @ params["cls_w"]               # (Cout, n_cls)
    b_head = (params["fc_feat_b"] @ params["proj_w"] + params["proj_b"]) @ params["cls_w"] \
             + params["cls_b"]                                                      # (n_cls,)
    w_head_p = jnp.zeros((Cout, n_cls_pad), jnp.float32).at[:, :num_classes].set(w_head)
    b_head_p = jnp.zeros((1, n_cls_pad), jnp.float32).at[:, :num_classes].set(b_head)

    return {"w36": w36, "b_conv": b_conv, "w_head_p": w_head_p, "b_head_p": b_head_p}


# ------------------------------------------------------------------------------------------------
# DiffModel (stage-1, eval) forward around the fused kernel.
# ------------------------------------------------------------------------------------------------
def diff_model_forward_test_stage1(x_nchw, kp, *, num_classes):
    B, Cin, H, W = x_nchw.shape
    K36, Cout = kp["w36"].shape
    n_cls_pad = kp["w_head_p"].shape[1]
    S = H * W                                                   # valid output positions per image

    # --- glue: im2col in the wrapper. Each row holds the full 3x3*Cin receptive field of one
    #     VALID output position, so per-image tiles need no halo and pooling is a plain mean. ----
    x_nhwc = jnp.transpose(x_nchw, (0, 2, 3, 1))
    x_pad = jnp.pad(x_nhwc, ((0, 0), (1, 1), (1, 1), (0, 0)))
    patches = [x_pad[:, di:di + H, dj:dj + W, :] for di in range(3) for dj in range(3)]
    x_col = jnp.concatenate(patches, axis=-1).reshape(B * S, K36).astype(jnp.float32)

    flops = 2 * B * S * K36 * Cout + 2 * B * Cout * n_cls_pad
    bytes_accessed = 4 * (x_col.size + kp["w36"].size + kp["b_conv"].size
                          + kp["w_head_p"].size + kp["b_head_p"].size + B * 8 * n_cls_pad)

    logits_padded = pl.pallas_call(
        functools.partial(_fused_kernel, inv_hw=1.0 / float(S)),
        out_shape=jax.ShapeDtypeStruct((B, 8, n_cls_pad), jnp.float32),
        grid=(B,),
        in_specs=[
            pl.BlockSpec((S, K36), lambda b: (b, 0)),           # per-image patch tile (pipelined)
            pl.BlockSpec((K36, Cout), lambda b: (0, 0)),        # weights stay resident across grid
            pl.BlockSpec((1, Cout), lambda b: (0, 0)),
            pl.BlockSpec((Cout, n_cls_pad), lambda b: (0, 0)),
            pl.BlockSpec((1, n_cls_pad), lambda b: (0, 0)),
        ],
        out_specs=pl.BlockSpec((1, 8, n_cls_pad), lambda b: (b, 0, 0)),
        compiler_params=pltpu.CompilerParams(dimension_semantics=("parallel",)),
        cost_estimate=pl.CostEstimate(flops=flops, transcendentals=0,
                                      bytes_accessed=bytes_accessed),
    )(x_col, kp["w36"], kp["b_conv"], kp["w_head_p"], kp["b_head_p"])

    return logits_padded[:, 0, :num_classes]

# TODO(synk): stage-2 paths (forward_train_stage2 / forward_test_stage2) depend on the external
# DiffLoss diffusion module (not defined in the reference snippet) and are not implemented here.


# ------------------------------------------------------------------------------------------------
# Pure-JAX reference (lax conv, unfolded head) to verify the fused Pallas path.
# ------------------------------------------------------------------------------------------------
def reference_forward(x_nchw, params):
    y = lax.conv_general_dilated(
        x_nchw, params["conv_w"], window_strides=(1, 1), padding=((1, 1), (1, 1)),
        dimension_numbers=("NCHW", "OIHW", "NCHW"))
    y = y + params["conv_b"][None, :, None, None]
    y = jnp.maximum(y, 0.0)
    pooled = jnp.mean(y, axis=(2, 3))                                   # (B, Cout)
    feats = pooled @ params["fc_feat_w"] + params["fc_feat_b"]
    projected = feats @ params["proj_w"] + params["proj_b"]
    return projected @ params["cls_w"] + params["cls_b"]


# ------------------------------------------------------------------------------------------------
if __name__ == "__main__":
    # Small shapes consistent with the module's structure.
    B, Cin, H, W = 2, 4, 16, 16
    Chid = 16                 # backbone conv channels (== Cout of the conv, feeds fc_feat)
    feature_dim = 32          # feature_dim != target_dim  =>  proj is a real nn.Linear
    target_dim = 64
    token_dim = 16            # target_dim % token_dim == 0 (module assertion)
    num_classes = 10

    key = jax.random.PRNGKey(0)
    ks = jax.random.split(key, 9)

    params = {
        "conv_w":    0.1 * jax.random.normal(ks[0], (Chid, Cin, 3, 3), jnp.float32),
        "conv_b":    0.05 * jax.random.normal(ks[1], (Chid,), jnp.float32),
        "fc_feat_w": 0.1 * jax.random.normal(ks[2], (Chid, feature_dim), jnp.float32),
        "fc_feat_b": 0.05 * jax.random.normal(ks[3], (feature_dim,), jnp.float32),
        "proj_w":    0.1 * jax.random.normal(ks[4], (feature_dim, target_dim), jnp.float32),
        "proj_b":    0.05 * jax.random.normal(ks[5], (target_dim,), jnp.float32),
        "cls_w":     0.1 * jax.random.normal(ks[6], (target_dim, num_classes), jnp.float32),
        "cls_b":     0.05 * jax.random.normal(ks[7], (num_classes,), jnp.float32),
    }

    x = jax.random.normal(ks[8], (B, Cin, H, W), jnp.float32)   # NCHW, PyTorch convention

    # Parameter-only folding: once per model, outside the per-call path.
    kp = jax.tree_util.tree_map(jax.block_until_ready, fold_params(params))

    fwd = jax.jit(functools.partial(diff_model_forward_test_stage1, num_classes=num_classes))
    logits = jax.block_until_ready(fwd(x, kp))

    ref = reference_forward(x, params)
    assert logits.shape == (B, num_classes), logits.shape
    assert jnp.allclose(logits, ref, rtol=1e-4, atol=2e-4), \
        f"max abs err {jnp.max(jnp.abs(logits - ref))}"

    print("KERNEL_OK")
</pallas_src>

<mosaic_0001>
module attributes {stable_mosaic.version = 11 : i64} {
  func.func @_fused_kernel(%arg0: i32, %arg1: memref<256x36xf32, #tpu.memory_space<vmem>>, %arg2: memref<36x16xf32, #tpu.memory_space<vmem>>, %arg3: memref<1x16xf32, #tpu.memory_space<vmem>>, %arg4: memref<16x128xf32, #tpu.memory_space<vmem>>, %arg5: memref<1x128xf32, #tpu.memory_space<vmem>>, %arg6: memref<1x8x128xf32, #tpu.memory_space<vmem>>) attributes {dimension_semantics = [#tpu.dimension_semantics<parallel>], iteration_bounds = array<i64: 2>, scalar_prefetch = 0 : i64, scratch_operands = 0 : i64, tpu.core_type = #tpu.core_type<tc>, window_params = [{transform_indices = @transform_0, window_bounds = array<i64: 256, 36>}, {pipeline_mode = #tpu.pipeline_mode<synchronous>, transform_indices = @transform_1, window_bounds = array<i64: 36, 16>}, {pipeline_mode = #tpu.pipeline_mode<synchronous>, transform_indices = @transform_2, window_bounds = array<i64: 1, 16>}, {pipeline_mode = #tpu.pipeline_mode<synchronous>, transform_indices = @transform_3, window_bounds = array<i64: 16, 128>}, {pipeline_mode = #tpu.pipeline_mode<synchronous>, transform_indices = @transform_4, window_bounds = array<i64: 1, 128>}, {transform_indices = @transform_5, window_bounds = array<i64: 1, 8, 128>}]} {
    %c0 = arith.constant 0 : index
    %c0_0 = arith.constant 0 : index
    %0 = vector.load %arg1[%c0, %c0_0] : memref<256x36xf32, #tpu.memory_space<vmem>>, vector<256x36xf32>
    %c0_1 = arith.constant 0 : index
    %c0_2 = arith.constant 0 : index
    %1 = vector.load %arg2[%c0_1, %c0_2] : memref<36x16xf32, #tpu.memory_space<vmem>>, vector<36x16xf32>
    %cst = arith.constant dense<0.000000e+00> : vector<256x16xf32>
    %2 = tpu.matmul %0, %1, %cst {dimension_numbers = #tpu.dot_dimension_numbers<[1], [0], [0], [1], [0, 0, 1, 1], [], []>} : vector<256x36xf32>, vector<36x16xf32>, vector<256x16xf32> -> vector<256x16xf32>
    %c0_3 = arith.constant 0 : index
    %c0_4 = arith.constant 0 : index
    %3 = vector.load %arg3[%c0_3, %c0_4] : memref<1x16xf32, #tpu.memory_space<vmem>>, vector<1x16xf32>
    %4 = vector.broadcast %3 : vector<1x16xf32> to vector<256x16xf32>
    %5 = arith.addf %2, %4 : vector<256x16xf32>
    %cst_5 = arith.constant 0.000000e+00 : f32
    %6 = vector.broadcast %cst_5 : f32 to vector<256x16xf32>
    %7 = arith.maximumf %5, %6 : vector<256x16xf32>
    %cst_6 = arith.constant dense<0.000000e+00> : vector<16xf32>
    %8 = vector.multi_reduction <add>, %7, %cst_6 [0] : vector<256x16xf32> to vector<16xf32>
    %9 = vector.shape_cast %8 : vector<16xf32> to vector<1x16xf32>
    %cst_7 = arith.constant 3.906250e-03 : f32
    %10 = vector.broadcast %cst_7 : f32 to vector<1x16xf32>
    %11 = arith.mulf %9, %10 : vector<1x16xf32>
    %c0_8 = arith.constant 0 : index
    %c0_9 = arith.constant 0 : index
    %12 = vector.load %arg4[%c0_8, %c0_9] : memref<16x128xf32, #tpu.memory_space<vmem>>, vector<16x128xf32>
    %cst_10 = arith.constant dense<0.000000e+00> : vector<1x128xf32>
    %13 = tpu.matmul %11, %12, %cst_10 {dimension_numbers = #tpu.dot_dimension_numbers<[1], [0], [0], [1], [0, 0, 1, 1], [], []>} : vector<1x16xf32>, vector<16x128xf32>, vector<1x128xf32> -> vector<1x128xf32>
    %c0_11 = arith.constant 0 : index
    %c0_12 = arith.constant 0 : index
    %14 = vector.load %arg5[%c0_11, %c0_12] : memref<1x128xf32, #tpu.memory_space<vmem>>, vector<1x128xf32>
    %15 = arith.addf %13, %14 : vector<1x128xf32>
    %16 = vector.shape_cast %15 : vector<1x128xf32> to vector<1x1x128xf32>
    %17 = vector.broadcast %16 : vector<1x1x128xf32> to vector<1x8x128xf32>
    %c0_13 = arith.constant 0 : index
    %c0_14 = arith.constant 0 : index
    %c0_15 = arith.constant 0 : index
    %18 = vector.load %arg6[%c0_13, %c0_14, %c0_15] : memref<1x8x128xf32, #tpu.memory_space<vmem>>, vector<1x8x128xf32>
    tpu.vector_store %arg6[%c0_13, %c0_14, %c0_15], %17 {strides = array<i32>} : memref<1x8x128xf32, #tpu.memory_space<vmem>>, vector<1x8x128xf32>,
    return
  }
  func.func @transform_0(%arg0: i32) -> (i32, i32) {
    %c0_i32 = arith.constant 0 : i32
    %c0_i32_0 = arith.constant 0 : i32
    return %arg0, %c0_i32 : i32, i32
  }
  func.func @transform_1(%arg0: i32) -> (i32, i32) {
    %c0_i32 = arith.constant 0 : i32
    %c0_i32_0 = arith.constant 0 : i32
    %c0_i32_1 = arith.constant 0 : i32
    return %c0_i32, %c0_i32_0 : i32, i32
  }
  func.func @transform_2(%arg0: i32) -> (i32, i32) {
    %c0_i32 = arith.constant 0 : i32
    %c0_i32_0 = arith.constant 0 : i32
    %c0_i32_1 = arith.constant 0 : i32
    return %c0_i32, %c0_i32_0 : i32, i32
  }
  func.func @transform_3(%arg0: i32) -> (i32, i32) {
    %c0_i32 = arith.constant 0 : i32
    %c0_i32_0 = arith.constant 0 : i32
    %c0_i32_1 = arith.constant 0 : i32
    return %c0_i32, %c0_i32_0 : i32, i32
  }
  func.func @transform_4(%arg0: i32) -> (i32, i32) {
    %c0_i32 = arith.constant 0 : i32
    %c0_i32_0 = arith.constant 0 : i32
    %c0_i32_1 = arith.constant 0 : i32
    return %c0_i32, %c0_i32_0 : i32, i32
  }
  func.func @transform_5(%arg0: i32) -> (i32, i32, i32) {
    %c0_i32 = arith.constant 0 : i32
    %c0_i32_0 = arith.constant 0 : i32
    %c0_i32_1 = arith.constant 0 : i32
    return %arg0, %c0_i32, %c0_i32_0 : i32, i32, i32
  }
}

</mosaic_0001>

<bundles_post_ra>
// kernel: diff_model_forward_test_stage1.1
= control target key start
LH: loop header
LB: loop body
LE: loop exit
PB: predicated region body
PF: predicated region fallthrough
CT: control target
= control target key end

     0   :  { %s1051_s18 = smov 0   ;;  %s1275_s0 = inlined_call_operand.vmem [shape: f32[512,36], index: 0, kind: input, shape index: {}]   ;;  %s1276_s1 = inlined_call_operand.vmem [shape: f32[36,16], index: 1, kind: input, shape index: {}]   ;;  %s1277_s2 = inlined_call_operand.vmem [shape: f32[1,16], index: 2, kind: input, shape index: {}]   ;;  %s1278_s3 = inlined_call_operand.vmem [shape: f32[16,128], index: 3, kind: input, shape index: {}]   ;;  %s1279_s4 = inlined_call_operand.vmem [shape: f32[1,128], index: 4, kind: input, shape index: {}]   ;;  %s1280_s5 = inlined_call_operand.vmem [shape: f32[2,8,128], index: 5, kind: output, shape index: {}]  }
   0x1 LB: > { %s1057_s19 = sadd.s32 4294967295, %s1016_s18   ;;  %p836_p0 = scmp.ge.s32.totalorder %s1016_s18, 1  ;;  %s1016_s18 = sphi %s1051_s18, %s15_s18  }
   0x2   : > { %p188_p1 = scmp.lt.s32.totalorder %s1016_s18, 3 }
   0x4   : > { %p189_p2 = pnand %p836_p0, %p188_p1 }
   0x5   : > { %v257_v0 = vld [vmem:[%s1276_s1] sm:$0xff] (!%p189_p2)  ;;  %v258_v1 = vld [vmem:[%s1276_s1 + $0x8] sm:$0xff] (!%p189_p2)  ;;  %v259_v2 = vld [vmem:[%s1276_s1 + $0x10] sm:$0xff] (!%p189_p2)  ;;  %s837_s26 = sshll.u32 (!%p189_p2), %s1057_s19, 5  ;;  %vm269_vm0 = vcmask (!%p189_p2), 293888   ;;  %vm366_vm1 = vcmask (!%p189_p2), 1043456  }
   0x6   : > { %192 = sbr.rel (%p189_p2) target bundleno = 531 (0x213), region = 40  ;;  %v982_v3 = vpack.c.bf16 (!%p189_p2), %v258_v1, %v257_v0  ;;  %v260_v4 = vld [vmem:[%s1276_s1 + $0x18] sm:$0xff] (!%p189_p2)  ;;  %p216_p3 = scmp.lt.s32.totalorder (!%p189_p2), %s837_s26, 63  ;;  %v261_v6 = vld [vmem:[%s1276_s1 + $0x20] sm:$0xf] (!%p189_p2)  ;;  %v699_v40 = vld [vmem:[%s1278_s3 + $0x8] sm:$0xff] (!%p189_p2) }
   0x7   : > { %v986_v5 = vpack.c.bf16 (!%p189_p2), %v260_v4, %v259_v2  ;;  %v698_v39 = vld [vmem:[%s1278_s3] sm:$0xff] (!%p189_p2)  ;;  %v1018_v41 = vmov (!%p189_p2), 0.0|0.0   ;;  %vm1019_vm2 = vmmov (!%p189_p2), 0   ;;  %v1020_v43 = vmov (!%p189_p2), 0.0   ;;  %p221_p4 = scmp.lt.s32.totalorder (!%p189_p2), %s1057_s19, 1 }
   0x8   : > { %983 = vmatprep.subr.bf16.mxu0 (!%p189_p2), %v982_v3  ;;  %993 = vmatprep.subr.bf16.mxu1 (!%p189_p2), %v982_v3  ;;  %v991_v42 = vpack.c.bf16 (!%p189_p2), %v699_v40, %v698_v39  ;;  %v1155_v44 = vld [vmem:[%s1277_s2] ss:$0 sm:$0xff] (!%p189_p2)  ;;  %vm627_vm3 = vcmask (!%p189_p2), 130048  }
   0x9   : > { %985 = vmatpush3.bf16.msra.mxu0 (!%p189_p2), %v982_v3  ;;  %996 = vmatpush3.bf16.msra.mxu1 (!%p189_p2), %v982_v3 }
   0xa   : > { %987 = vmatprep.subr.bf16.mxu0 (!%p189_p2), %v986_v5  ;;  %994 = vmatprep.subr.bf16.mxu1 (!%p189_p2), %v986_v5 }
   0xd   : > { %s1282_s26 = smov (!%p216_p3, %s837_s26), 63  ;;  %989 = vmatpush3.bf16.msra.mxu0 %v986_v5  ;;  %997 = vmatpush3.bf16.msra.mxu1 %v986_v5  ;;  %s1284_s19 = smov (!%p221_p4, %s1057_s19), 1 }
   0xe   : > { %s838_s29 = sshll.u32 %s1282_s26, 3  ;;  %925 = vmatprep.subr.msk.mxu0 %vm366_vm1, %v261_v6  ;;  %995 = vmatprep.subr.msk.mxu1 %vm366_vm1, %v261_v6  ;;  %s839_s20 = sshll.u32 %s1284_s19, 3 }
   0xf   : > { %s1080_s9 = scalar_lea.vmem %s1275_s0, %s838_s29  ;;  %s224_s23 = scalar_lea.vmem %s1280_s5, %s839_s20 }
  0x10   : > { %v225_v7 = vld [vmem:[%s1080_s9] sm:$0xff]  ;;  %v226_v8 = vld [vmem:[%s1080_s9 + $0x8] sm:$0xff]  ;;  %v227_v9 = vld [vmem:[%s1080_s9 + $0x10] sm:$0xff] }
  0x11   : > { %927 = vmatprep.mubr.msk.f32.mxu0 %vm269_vm0, %v225_v7  ;;  %926 = vmatpush3.msk.msra.mxu0 %vm366_vm1, %v261_v6  ;;  %v243_v10 = vld [vmem:[%s1080_s9 + $0x90] sm:$0xff]  ;;  %v244_v11 = vld [vmem:[%s1080_s9 + $0x98] sm:$0xff]  ;;  %v245_v12 = vld [vmem:[%s1080_s9 + $0xa0] sm:$0xff] }
  0x12   : > { %928 = vmatmul.mubr.msk.f32.vlgmr.msra.gmra.mrb[0].mxu0 %vm269_vm0, %v226_v8  ;;  %998 = vmatpush3.msk.msra.mxu1 %vm366_vm1, %v261_v6  ;;  %v228_v13 = vld [vmem:[%s1080_s9 + $0x18] sm:$0xff]  ;;  %v229_v14 = vld [vmem:[%s1080_s9 + $0x20] sm:$0xff]  ;;  %v246_v15 = vld [vmem:[%s1080_s9 + $0xa8] sm:$0xff] }
  0x13   : > { %930 = vmatprep.mubr.msk.f32.mxu0 %vm269_vm0, %v227_v9  ;;  %954 = vmatprep.mubr.msk.f32.mxu1 %vm269_vm0, %v243_v10  ;;  %v247_v16 = vld [vmem:[%s1080_s9 + $0xb0] sm:$0xff]  ;;  %v230_v17 = vld [vmem:[%s1080_s9 + $0x28] sm:$0xff]  ;;  %v248_v19 = vld [vmem:[%s1080_s9 + $0xb8] sm:$0xff] }
  0x14   : > { %955 = vmatmul.mubr.msk.f32.vlgmr.msra.gmra.mrb[0].mxu1 %vm269_vm0, %v244_v11  ;;  %v231_v18 = vld [vmem:[%s1080_s9 + $0x30] sm:$0xff]  ;;  %v249_v20 = vld [vmem:[%s1080_s9 + $0xc0] sm:$0xff]  ;;  %v232_v21 = vld [vmem:[%s1080_s9 + $0x38] sm:$0xff]  ;;  %990 = vmatprep.subr.bf16.mxu1 %v1018_v41 }
  0x15   : > { %957 = vmatprep.mubr.msk.f32.mxu1 %vm269_vm0, %v245_v12  ;;  %v233_v22 = vld [vmem:[%s1080_s9 + $0x40] sm:$0xff]  ;;  %v250_v23 = vld [vmem:[%s1080_s9 + $0xc8] sm:$0xff]  ;;  %v251_v24 = vld [vmem:[%s1080_s9 + $0xd0] sm:$0xff]  ;;  %992 = vmatpush3.bf16.msra.mxu1 %v991_v42 }
  0x16   : > { %931 = vmatmul.mubr.msk.f32.gmra.mrb[2].mxu0 %vm269_vm0, %v228_v13  ;;  %v234_v25 = vld [vmem:[%s1080_s9 + $0x48] sm:$0xff]  ;;  %v235_v26 = vld [vmem:[%s1080_s9 + $0x50] sm:$0xff]  ;;  %v252_v27 = vld [vmem:[%s1080_s9 + $0xd8] sm:$0xff] }
  0x17   : > { %933 = vmatprep.mubr.msk.f32.mxu0 %vm269_vm0, %v229_v14  ;;  %v253_v28 = vld [vmem:[%s1080_s9 + $0xe0] sm:$0xff]  ;;  %v236_v29 = vld [vmem:[%s1080_s9 + $0x58] sm:$0xff]  ;;  %v254_v31 = vld [vmem:[%s1080_s9 + $0xe8] sm:$0xff] }
  0x18   : > { %958 = vmatmul.mubr.msk.f32.gmra.mrb[2].mxu1 %vm269_vm0, %v246_v15  ;;  %v237_v30 = vld [vmem:[%s1080_s9 + $0x60] sm:$0xff]  ;;  %v255_v32 = vld [vmem:[%s1080_s9 + $0xf0] sm:$0xff]  ;;  %v238_v33 = vld [vmem:[%s1080_s9 + $0x68] sm:$0xff] }
  0x19   : > { %960 = vmatprep.mubr.msk.f32.mxu1 %vm269_vm0, %v247_v16  ;;  %v239_v34 = vld [vmem:[%s1080_s9 + $0x70] sm:$0xff]  ;;  %v256_v35 = vld [vmem:[%s1080_s9 + $0xf8] sm:$0xff]  ;;  %v241_v37 = vld [vmem:[%s1080_s9 + $0x80] sm:$0xff] }
  0x1a   : > { %934 = vmatmul.mubr.msk.f32.gmra.mrb[4].mxu0 %vm269_vm0, %v230_v17  ;;  %v240_v36 = vld [vmem:[%s1080_s9 + $0x78] sm:$0xff]  ;;  %v242_v38 = vld [vmem:[%s1080_s9 + $0x88] sm:$0xff] }
  0x1b   : > { %936 = vmatprep.mubr.msk.f32.mxu0 %vm269_vm0, %v231_v18 }
  0x1c   : > { %961 = vmatmul.mubr.msk.f32.gmra.mrb[4].mxu1 %vm269_vm0, %v248_v19 }
  0x1d   : > { %963 = vmatprep.mubr.msk.f32.mxu1 %vm269_vm0, %v249_v20 }
  0x1e   : > { %937 = vmatmul.mubr.msk.f32.gmra.mrb[6].mxu0 %vm269_vm0, %v232_v21 }
  0x1f   : > { %939 = vmatprep.mubr.msk.f32.mxu0 %vm269_vm0, %v233_v22 }
  0x20   : > { %964 = vmatmul.mubr.msk.f32.gmra.mrb[6].mxu1 %vm269_vm0, %v250_v23 }
  0x21   : > { %966 = vmatprep.mubr.msk.f32.mxu1 %vm269_vm0, %v251_v24 }
  0x22   : > { %940 = vmatmul.mubr.msk.f32.gmra.mrb[8].mxu0 %vm269_vm0, %v234_v25 }
  0x23   : > { %942 = vmatprep.mubr.msk.f32.mxu0 %vm269_vm0, %v235_v26 }
  0x24   : > { %967 = vmatmul.mubr.msk.f32.gmra.mrb[8].mxu1 %vm269_vm0, %v252_v27 }
  0x25   : > { %969 = vmatprep.mubr.msk.f32.mxu1 %vm269_vm0, %v253_v28 }
  0x26   : > { %943 = vmatmul.mubr.msk.f32.gmra.mrb[10].mxu0 %vm269_vm0, %v236_v29 }
  0x27   : > { %945 = vmatprep.mubr.msk.f32.mxu0 %vm269_vm0, %v237_v30 }
  0x28   : > { %970 = vmatmul.mubr.msk.f32.gmra.mrb[10].mxu1 %vm269_vm0, %v254_v31 }
  0x29   : > { %972 = vmatprep.mubr.msk.f32.mxu1 %vm269_vm0, %v255_v32 }
  0x2a   : > { %946 = vmatmul.mubr.msk.f32.gmra.mrb[12].mxu0 %vm269_vm0, %v238_v33 }
  0x2b   : > { %948 = vmatprep.mubr.msk.f32.mxu0 %vm269_vm0, %v239_v34 }
  0x2c   : > { %973 = vmatmul.mubr.msk.f32.gmra.mrb[12].mxu1 %vm269_vm0, %v256_v35 }
  0x2d   : > { %979 = vmatprep.mubr.msk.f32.mxu1 %vm1019_vm2, %v1020_v43 }
  0x2e   : > { %949 = vmatmul.mubr.msk.f32.gmra.mrb[14].mxu0 %vm269_vm0, %v240_v36 }
  0x2f   : > { %951 = vmatprep.mubr.msk.f32.mxu0 %vm269_vm0, %v241_v37 }
  0x32   : > { %952 = vmatmul.mubr.msk.f32.gmra.mrb[16].mxu0 %vm269_vm0, %v242_v38 }
  0xe5   : > { %v929_v45 = vpop.f32.mrb[0].mxu0 }
  0xe6   : > { %v442_v46 = vadd.f32 %v929_v45, %v1155_v44  ;;  %v436_v47 = vpop.f32.mrb[1].mxu0 }
  0xe7   : > { %v437_v48 = vadd.f32 %v1155_v44, %v436_v47  ;;  %v1159_v49 = vpop.f32.mrb[0].mxu1 }
  0xe8   : > { %v596_v50 = vmax.f32 %v442_v46, 0.0  ;;  %v1161_v51 = vpop.f32.mrb[1].mxu1 }
  0xe9   : > { %v595_v52 = vmax.f32 %v437_v48, 0.0  ;;  %v932_v53 = vpop.f32.mrb[2].mxu0 }
  0xea   : > { %v629_v54 = vsel %vm627_vm3, %v596_v50, 0.0  ;;  %v452_v55 = vadd.f32 %v932_v53, %v1155_v44  ;;  %v446_v56 = vpop.f32.mrb[3].mxu0 }
  0xeb   : > { %v628_v57 = vsel %vm627_vm3, %v595_v52, 0.0  ;;  %v447_v58 = vadd.f32 %v1155_v44, %v446_v56  ;;  %v1167_v59 = vpop.f32.mrb[2].mxu1 }
  0xec   : > { %v630_v60 = vadd.f32 %v629_v54, %v628_v57  ;;  %v1169_v61 = vpop.f32.mrb[3].mxu1  ;;  %v598_v62 = vmax.f32 %v452_v55, 0.0 }
  0xed   : > { %v597_v63 = vmax.f32 %v447_v58, 0.0  ;;  %v935_v0 = vpop.f32.mrb[4].mxu0 }
  0xee   : > { %v462_v1 = vadd.f32 %v935_v0, %v1155_v44  ;;  %v456_v2 = vpop.f32.mrb[5].mxu0  ;;  %v633_v8 = vsel %vm627_vm3, %v598_v62, 0.0 }
  0xef   : > { %v631_v3 = vsel %vm627_vm3, %v597_v63, 0.0  ;;  %v457_v4 = vadd.f32 %v1155_v44, %v456_v2  ;;  %v1174_v5 = vpop.f32.mrb[4].mxu1 }
  0xf0   : > { %v632_v6 = vadd.f32 %v631_v3, %v630_v60  ;;  %v1176_v7 = vpop.f32.mrb[5].mxu1  ;;  %v600_v9 = vmax.f32 %v462_v1, 0.0 }
  0xf1   : > { %v599_v10 = vmax.f32 %v457_v4, 0.0  ;;  %v938_v11 = vpop.f32.mrb[6].mxu0 }
  0xf2   : > { %v634_v12 = vadd.f32 %v633_v8, %v632_v6  ;;  %v472_v13 = vadd.f32 %v938_v11, %v1155_v44  ;;  %v466_v14 = vpop.f32.mrb[7].mxu0  ;;  %v637_v20 = vsel %vm627_vm3, %v600_v9, 0.0  ;;  %v527_v9 = vadd.f32 %v1155_v44, %v1161_v51 }
  0xf3   : > { %v635_v15 = vsel %vm627_vm3, %v599_v10, 0.0  ;;  %v467_v16 = vadd.f32 %v1155_v44, %v466_v14  ;;  %v1182_v17 = vpop.f32.mrb[6].mxu1 }
  0xf4   : > { %v636_v18 = vadd.f32 %v635_v15, %v634_v12  ;;  %v1184_v19 = vpop.f32.mrb[7].mxu1  ;;  %v602_v21 = vmax.f32 %v472_v13, 0.0 }
  0xf5   : > { %v601_v22 = vmax.f32 %v467_v16, 0.0  ;;  %v941_v23 = vpop.f32.mrb[8].mxu0 }
  0xf6   : > { %v638_v24 = vadd.f32 %v637_v20, %v636_v18  ;;  %v482_v25 = vadd.f32 %v941_v23, %v1155_v44  ;;  %v476_v26 = vpop.f32.mrb[9].mxu0  ;;  %v641_v32 = vsel %vm627_vm3, %v602_v21, 0.0  ;;  %v613_v23 = vmax.f32 %v527_v9, 0.0 }
  0xf7   : > { %v639_v27 = vsel %vm627_vm3, %v601_v22, 0.0  ;;  %v477_v28 = vadd.f32 %v1155_v44, %v476_v26  ;;  %v1190_v29 = vpop.f32.mrb[8].mxu1  ;;  %v532_v22 = vadd.f32 %v1159_v49, %v1155_v44  ;;  %v537_v26 = vadd.f32 %v1155_v44, %v1169_v61 }
  0xf8   : > { %v640_v30 = vadd.f32 %v639_v27, %v638_v24  ;;  %v1192_v31 = vpop.f32.mrb[9].mxu1  ;;  %v604_v33 = vmax.f32 %v482_v25, 0.0  ;;  %v663_v49 = vsel %vm627_vm3, %v613_v23, 0.0 }
  0xf9   : > { %v603_v34 = vmax.f32 %v477_v28, 0.0  ;;  %v944_v35 = vpop.f32.mrb[10].mxu0 }
  0xfa   : > { %v642_v36 = vadd.f32 %v641_v32, %v640_v30  ;;  %v492_v37 = vadd.f32 %v944_v35, %v1155_v44  ;;  %v486_v38 = vpop.f32.mrb[11].mxu0  ;;  %v645_v45 = vsel %vm627_vm3, %v604_v33, 0.0  ;;  %v614_v32 = vmax.f32 %v532_v22, 0.0 }
  0xfb   : > { %v643_v39 = vsel %vm627_vm3, %v603_v34, 0.0  ;;  %v487_v40 = vadd.f32 %v1155_v44, %v486_v38  ;;  %v1198_v41 = vpop.f32.mrb[10].mxu1  ;;  %v542_v33 = vadd.f32 %v1167_v59, %v1155_v44  ;;  %v615_v35 = vmax.f32 %v537_v26, 0.0 }
  0xfc   : > { %v644_v42 = vadd.f32 %v643_v39, %v642_v36  ;;  %v1200_v43 = vpop.f32.mrb[11].mxu1  ;;  %v606_v46 = vmax.f32 %v492_v37, 0.0  ;;  %v547_v36 = vadd.f32 %v1155_v44, %v1176_v7  ;;  %v665_v38 = vsel %vm627_vm3, %v614_v32, 0.0 }
  0xfd   : > { %v605_v47 = vmax.f32 %v487_v40, 0.0  ;;  %v947_v48 = vpop.f32.mrb[12].mxu0  ;;  %v616_v39 = vmax.f32 %v542_v33, 0.0  ;;  %v667_v40 = vsel %vm627_vm3, %v615_v35, 0.0  ;;  %v557_v59 = vadd.f32 %v1155_v44, %v1184_v19 }
  0xfe   : > { %v646_v50 = vadd.f32 %v645_v45, %v644_v42  ;;  %v502_v52 = vadd.f32 %v947_v48, %v1155_v44  ;;  %v496_v53 = vpop.f32.mrb[13].mxu0  ;;  %v649_v60 = vsel %vm627_vm3, %v606_v46, 0.0  ;;  %v552_v42 = vadd.f32 %v1174_v5, %v1155_v44 }
  0xff   : > { %v647_v54 = vsel %vm627_vm3, %v605_v47, 0.0  ;;  %v497_v55 = vadd.f32 %v1155_v44, %v496_v53  ;;  %v1206_v56 = vpop.f32.mrb[12].mxu1  ;;  %v617_v45 = vmax.f32 %v547_v36, 0.0  ;;  %v669_v47 = vsel %vm627_vm3, %v616_v39, 0.0 }
 0x100   : > { %v648_v57 = vadd.f32 %v647_v54, %v646_v50  ;;  %v1208_v58 = vpop.f32.mrb[13].mxu1  ;;  %v608_v62 = vmax.f32 %v502_v52, 0.0  ;;  %v562_v7 = vadd.f32 %v1182_v17, %v1155_v44  ;;  %v618_v50 = vmax.f32 %v552_v42, 0.0 }
 0x101   : > { %v607_v63 = vmax.f32 %v497_v55, 0.0  ;;  %v950_v0 = vpop.f32.mrb[14].mxu0  ;;  %v671_v52 = vsel %vm627_vm3, %v617_v45, 0.0  ;;  %v619_v53 = vmax.f32 %v557_v59, 0.0  ;;  %v567_v54 = vadd.f32 %v1155_v44, %v1192_v31 }
 0x102   : > { %v650_v1 = vadd.f32 %v649_v60, %v648_v57  ;;  %v512_v2 = vadd.f32 %v950_v0, %v1155_v44  ;;  %v506_v3 = vpop.f32.mrb[15].mxu0  ;;  %v653_v10 = vsel %vm627_vm3, %v608_v62, 0.0  ;;  %v620_v57 = vmax.f32 %v562_v7, 0.0 }
 0x103   : > { %v651_v4 = vsel %vm627_vm3, %v607_v63, 0.0  ;;  %v507_v6 = vadd.f32 %v1155_v44, %v506_v3  ;;  %v572_v19 = vadd.f32 %v1190_v29, %v1155_v44  ;;  %v673_v60 = vsel %vm627_vm3, %v618_v50, 0.0 }
 0x104   : > { %v652_v8 = vadd.f32 %v651_v4, %v650_v1  ;;  %v610_v11 = vmax.f32 %v512_v2, 0.0  ;;  %v675_v62 = vsel %vm627_vm3, %v619_v53, 0.0  ;;  %v621_v63 = vmax.f32 %v567_v54, 0.0 }
 0x105   : > { %v609_v12 = vmax.f32 %v507_v6, 0.0  ;;  %v953_v13 = vpop.f32.mrb[16].mxu0  ;;  %v577_v17 = vadd.f32 %v1155_v44, %v1200_v43  ;;  %v677_v1 = vsel %vm627_vm3, %v620_v57, 0.0  ;;  %v622_v3 = vmax.f32 %v572_v19, 0.0 }
 0x106   : > { %v654_v14 = vadd.f32 %v653_v10, %v652_v8  ;;  %v522_v15 = vadd.f32 %v953_v13, %v1155_v44  ;;  %v516_v16 = vpop.f32.mrb[17].mxu0  ;;  %v657_v51 = vsel %vm627_vm3, %v610_v11, 0.0  ;;  %v679_v31 = vsel %vm627_vm3, %v621_v63, 0.0 }
 0x107   : > { %v655_v18 = vsel %vm627_vm3, %v609_v12, 0.0  ;;  %v517_v20 = vadd.f32 %v1155_v44, %v516_v16  ;;  %v582_v4 = vadd.f32 %v1198_v41, %v1155_v44  ;;  %v623_v6 = vmax.f32 %v577_v17, 0.0 }
 0x108   : > { %v656_v21 = vadd.f32 %v655_v18, %v654_v14  ;;  %v612_v24 = vmax.f32 %v522_v15, 0.0  ;;  %v587_v29 = vadd.f32 %v1155_v44, %v1208_v58  ;;  %v681_v9 = vsel %vm627_vm3, %v622_v3, 0.0 }
 0x109   : > { %v611_v25 = vmax.f32 %v517_v20, 0.0  ;;  %v624_v11 = vmax.f32 %v582_v4, 0.0  ;;  %v683_v43 = vsel %vm627_vm3, %v623_v6, 0.0  ;;  %v592_v12 = vadd.f32 %v1206_v56, %v1155_v44 }
 0x10a   : > { %v658_v27 = vadd.f32 %v657_v51, %v656_v21  ;;  %v661_v34 = vsel %vm627_vm3, %v612_v24, 0.0  ;;  %v625_v13 = vmax.f32 %v587_v29, 0.0 }
 0x10b   : > { %v659_v28 = vsel %vm627_vm3, %v611_v25, 0.0  ;;  %v685_v41 = vsel %vm627_vm3, %v624_v11, 0.0  ;;  %v626_v16 = vmax.f32 %v592_v12, 0.0 }
 0x10c   : > { %v660_v30 = vadd.f32 %v659_v28, %v658_v27  ;;  %v687_v58 = vsel %vm627_vm3, %v625_v13, 0.0  ;;  %v774_v27 = vlaneseq }
 0x10d   : > { %v689_v21 = vsel %vm627_vm3, %v626_v16, 0.0 }
 0x10e   : > { %v662_v37 = vadd.f32 %v661_v34, %v660_v30  ;;  %v775_v28 = vshrl.u32 %v774_v27, 7  ;;  %v700_v30 = vld [vmem:[%s1279_s4] sm:$0x1] }
 0x110   : > { %v664_v61 = vadd.f32 %v663_v49, %v662_v37  ;;  %v776_v32 = vsub.s32 0, %v775_v28 }
 0x112   : > { %v666_v46 = vadd.f32 %v665_v38, %v664_v61 }
 0x114   : > { %v668_v48 = vadd.f32 %v667_v40, %v666_v46 }
 0x116   : > { %v670_v55 = vadd.f32 %v669_v47, %v668_v48 }
 0x118   : > { %v672_v5 = vadd.f32 %v671_v52, %v670_v55 }
 0x11a   : > { %v674_v0 = vadd.f32 %v673_v60, %v672_v5 }
 0x11c   : > { %v676_v2 = vadd.f32 %v675_v62, %v674_v0 }
 0x11e   : > { %v678_v8 = vadd.f32 %v677_v1, %v676_v2 }
 0x120   : > { %v680_v10 = vadd.f32 %v679_v31, %v678_v8 }
 0x122   : > { %v682_v14 = vadd.f32 %v681_v9, %v680_v10 }
 0x124   : > { %v684_v15 = vadd.f32 %v683_v43, %v682_v14 }
 0x126   : > { %v686_v18 = vadd.f32 %v685_v41, %v684_v15 }
 0x128   : > { %v688_v20 = vadd.f32 %v687_v58, %v686_v18 }
 0x12a   : > { %v690_v22 = vadd.f32 %v689_v21, %v688_v20 }
 0x12c   : > { %v691_v23 = vrot.slane %v690_v22, 4 }
 0x12e   : > { %v692_v51 = vadd.f32 %v691_v23, %v690_v22 }
 0x130   : > { %v693_v24 = vrot.slane %v692_v51, 2 }
 0x132   : > { %v694_v25 = vadd.f32 %v693_v24, %v692_v51 }
 0x134   : > { %v695_v44 = vrot.slane %v694_v25, 1 }
 0x136   : > { %v696_v56 = vadd.f32 %v695_v44, %v694_v25 }
 0x138   : > { %v697_v26 = vmul.f32 0.00390625, %v696_v56 }
 0x13a   : > { %980 = vmatmul.mubr.msk.f32.vlgmr.msra.gmra.mrb[14].mxu1 %vm627_vm3, %v697_v26 }
 0x20d   : > { %v770_v33 = vpop.f32.mrb[14].mxu1 }
 0x20e   : > { %v771_v34 = vadd.f32 %v770_v33, %v700_v30  ;;  %v981_v49 = vpop.f32.mrb[15].mxu1 }
 0x210   : > { %v777_v35 = vrot.slane %v771_v34, %v776_v32 }
 0x212   : > { %778 = vst [vmem:[%s224_s23] sm:$0xff] %v777_v35 }
 0x213 PF: > { %s15_s18 = sadd.s32 1, %s1016_s18  }
 0x214   : > { %p12_p5 = scmp.ge.s32.totalorder %s15_s18, 4  }
 0x216   :  { %14 = sbr.rel (!%p12_p5) target bundleno = 1 (0x1), region = 70 }

</bundles_post_ra>
